<compile_context>
chip_gen: v7x
topology: tpu7x:2x2x1
jax: 0.10.0
libtpu: 0.0.40
codegen_flags: <defaults>
</compile_context>

<pallas_src>
import jax
import jax.numpy as jnp
from jax import lax
from jax.experimental import pallas as pl
from jax.experimental.pallas import tpu as pltpu


def dynamics_kernel(x_ref, w1t_ref, b1_ref, w2_ref, b2_ref, out_ref):
    # x_ref:   (tb, input_dim)            batch-major, streamed from HBM
    # w1t_ref: (hidden_dim, input_dim)    fc1 weight, pre-transposed (tiny)
    # b1_ref:  (hidden_dim, 1)
    # w2_ref:  (hidden_dim, output_dim)   fc2 weight, natural layout
    # b2_ref:  (1, output_dim)
    # out_ref: (tb, output_dim)           batch-major
    x = x_ref[...]

    # h = W1^T @ x^T  -> (hidden, tb): lane-dense (batch on the lane axis),
    # expressed as a contraction on x's last dim -- no materialized transpose.
    h = lax.dot_general(
        w1t_ref[...], x,
        dimension_numbers=(((1,), (1,)), ((), ())),
        preferred_element_type=jnp.float32,
    ) + b1_ref[...]
    h = jnp.tanh(h)

    # y = h^T @ W2 -> (tb, output_dim): contracts h's leading (hidden) dim,
    # result is already batch-major for the store.
    y = lax.dot_general(
        h.astype(w2_ref.dtype), w2_ref[...],
        dimension_numbers=(((0,), (0,)), ((), ())),
        preferred_element_type=jnp.float32,
    ) + b2_ref[...]

    out_ref[...] = y.astype(out_ref.dtype)


def dynamics_forward(x, w1, b1, w2, b2, *, tb=8192):
    """Forward pass of Dynamics.

    x:  (B, input_dim) float32
    w1: (input_dim, hidden_dim)   b1: (hidden_dim,)
    w2: (hidden_dim, output_dim)  b2: (output_dim,)
    Returns (B, output_dim) float32.

    tb: target batch-tile (rows per grid step).  Large tiles amortize the
        ~0.35 us per-grid-step pipeline overhead; the effective tile is
        balanced across steps and sublane-aligned automatically.
    """
    B, input_dim = x.shape
    hidden_dim = w1.shape[1]
    output_dim = w2.shape[1]

    if B <= tb:
        # Single grid step; block == full array so no alignment constraint.
        # (For very tiny batches a plain XLA fusion would be even cheaper,
        # but the Pallas path is kept so one code path serves all sizes.)
        tb_eff = B
    else:
        # Balance work across grid steps (helps megacore sharding on v7x)
        # and keep the sublane dim a multiple of 8.
        n_steps = pl.cdiv(B, tb)
        tb_eff = ((pl.cdiv(B, n_steps) + 7) // 8) * 8
    grid = (pl.cdiv(B, tb_eff),)

    # Tiny parameter reshapes/transposes (a few KB, done once per call).
    w1t = w1.T                              # (hidden_dim, input_dim)
    b1c = b1.reshape(hidden_dim, 1)
    b2r = b2.reshape(1, output_dim)

    itemsize = jnp.dtype(x.dtype).itemsize
    cost = pl.CostEstimate(
        flops=2 * B * (input_dim * hidden_dim + hidden_dim * output_dim),
        transcendentals=B * hidden_dim,
        bytes_accessed=itemsize * (
            B * (input_dim + output_dim)
            + input_dim * hidden_dim + hidden_dim
            + hidden_dim * output_dim + output_dim),
    )

    return pl.pallas_call(
        dynamics_kernel,
        out_shape=jax.ShapeDtypeStruct((B, output_dim), x.dtype),
        grid_spec=pl.GridSpec(
            grid=grid,
            in_specs=[
                # batch-tiled input (ragged last block handled by Pallas)
                pl.BlockSpec((tb_eff, input_dim), lambda i: (i, 0)),
                # weights / biases: tiny, constant block index -> resident
                pl.BlockSpec((hidden_dim, input_dim), lambda i: (0, 0)),
                pl.BlockSpec((hidden_dim, 1), lambda i: (0, 0)),
                pl.BlockSpec((hidden_dim, output_dim), lambda i: (0, 0)),
                pl.BlockSpec((1, output_dim), lambda i: (0, 0)),
            ],
            out_specs=pl.BlockSpec((tb_eff, output_dim), lambda i: (i, 0)),
        ),
        compiler_params=pltpu.CompilerParams(
            dimension_semantics=("parallel",),
            vmem_limit_bytes=48 * 1024 * 1024,
        ),
        cost_estimate=cost,
    )(x, w1t, b1c, w2, b2r)


def reference_forward(x, w1, b1, w2, b2):
    h = jnp.tanh(x @ w1 + b1)
    return h @ w2 + b2


if __name__ == "__main__":
    # Shapes consistent with the module: Dynamics(input_dim=16, hidden_dim=32,
    # output_dim=16), batch=16.
    B, input_dim, hidden_dim, output_dim = 16, 16, 32, 16

    key = jax.random.PRNGKey(0)
    kx, kw1, kb1, kw2, kb2 = jax.random.split(key, 5)

    x = jax.random.normal(kx, (B, input_dim), dtype=jnp.float32)

    # Deterministic parameter init (uniform, like PyTorch's default Linear
    # init scale), stored as [in_features, out_features].
    bound1 = 1.0 / (input_dim ** 0.5)
    w1 = jax.random.uniform(kw1, (input_dim, hidden_dim), jnp.float32,
                            -bound1, bound1)
    b1 = jax.random.uniform(kb1, (hidden_dim,), jnp.float32, -bound1, bound1)

    bound2 = 1.0 / (hidden_dim ** 0.5)
    w2 = jax.random.uniform(kw2, (hidden_dim, output_dim), jnp.float32,
                            -bound2, bound2)
    b2 = jax.random.uniform(kb2, (output_dim,), jnp.float32, -bound2, bound2)

    # Small batch: single grid step.
    out = jax.block_until_ready(dynamics_forward(x, w1, b1, w2, b2))
    ref = reference_forward(x, w1, b1, w2, b2)
    assert out.shape == (B, output_dim)
    assert jnp.allclose(out, ref, atol=1e-4, rtol=1e-4)

    # Multi-step grid with a ragged tail (B not a multiple of the tile).
    B2 = 300
    x2 = jax.random.normal(jax.random.PRNGKey(1), (B2, input_dim), jnp.float32)
    out2 = jax.block_until_ready(dynamics_forward(x2, w1, b1, w2, b2, tb=128))
    ref2 = reference_forward(x2, w1, b1, w2, b2)
    assert out2.shape == (B2, output_dim)
    assert jnp.allclose(out2, ref2, atol=1e-4, rtol=1e-4)

    # Default (large) tile, multi-step ragged grid.
    B3 = 20000
    x3 = jax.random.normal(jax.random.PRNGKey(2), (B3, input_dim), jnp.float32)
    out3 = jax.block_until_ready(dynamics_forward(x3, w1, b1, w2, b2))
    ref3 = reference_forward(x3, w1, b1, w2, b2)
    assert out3.shape == (B3, output_dim)
    assert jnp.allclose(out3, ref3, atol=1e-4, rtol=1e-4)

    print("KERNEL_OK")
</pallas_src>

<mosaic_0001>
module attributes {stable_mosaic.version = 11 : i64} {
  func.func @dynamics_kernel(%arg0: i32, %arg1: memref<16x16xf32, #tpu.memory_space<vmem>>, %arg2: memref<32x16xf32, #tpu.memory_space<vmem>>, %arg3: memref<32x1xf32, #tpu.memory_space<vmem>>, %arg4: memref<32x16xf32, #tpu.memory_space<vmem>>, %arg5: memref<1x16xf32, #tpu.memory_space<vmem>>, %arg6: memref<16x16xf32, #tpu.memory_space<vmem>>) attributes {dimension_semantics = [#tpu.dimension_semantics<parallel>], iteration_bounds = array<i64: 1>, scalar_prefetch = 0 : i64, scratch_operands = 0 : i64, tpu.core_type = #tpu.core_type<tc>, window_params = [{transform_indices = @transform_0, window_bounds = array<i64: 16, 16>}, {pipeline_mode = #tpu.pipeline_mode<synchronous>, transform_indices = @transform_1, window_bounds = array<i64: 32, 16>}, {pipeline_mode = #tpu.pipeline_mode<synchronous>, transform_indices = @transform_2, window_bounds = array<i64: 32, 1>}, {pipeline_mode = #tpu.pipeline_mode<synchronous>, transform_indices = @transform_3, window_bounds = array<i64: 32, 16>}, {pipeline_mode = #tpu.pipeline_mode<synchronous>, transform_indices = @transform_4, window_bounds = array<i64: 1, 16>}, {transform_indices = @transform_5, window_bounds = array<i64: 16, 16>}]} {
    %c0 = arith.constant 0 : index
    %c0_0 = arith.constant 0 : index
    %0 = vector.load %arg1[%c0, %c0_0] : memref<16x16xf32, #tpu.memory_space<vmem>>, vector<16x16xf32>
    %c0_1 = arith.constant 0 : index
    %c0_2 = arith.constant 0 : index
    %1 = vector.load %arg2[%c0_1, %c0_2] : memref<32x16xf32, #tpu.memory_space<vmem>>, vector<32x16xf32>
    %cst = arith.constant dense<0.000000e+00> : vector<32x16xf32>
    %2 = tpu.matmul %1, %0, %cst {dimension_numbers = #tpu.dot_dimension_numbers<[1], [1], [0], [0], [0, 0, 1, 0], [], []>} : vector<32x16xf32>, vector<16x16xf32>, vector<32x16xf32> -> vector<32x16xf32>
    %c0_3 = arith.constant 0 : index
    %c0_4 = arith.constant 0 : index
    %3 = vector.load %arg3[%c0_3, %c0_4] : memref<32x1xf32, #tpu.memory_space<vmem>>, vector<32x1xf32>
    %4 = vector.broadcast %3 : vector<32x1xf32> to vector<32x16xf32>
    %5 = arith.addf %2, %4 : vector<32x16xf32>
    %6 = math.tanh %5 : vector<32x16xf32>
    %c0_5 = arith.constant 0 : index
    %c0_6 = arith.constant 0 : index
    %7 = vector.load %arg4[%c0_5, %c0_6] : memref<32x16xf32, #tpu.memory_space<vmem>>, vector<32x16xf32>
    %cst_7 = arith.constant dense<0.000000e+00> : vector<16x16xf32>
    %8 = tpu.matmul %6, %7, %cst_7 {dimension_numbers = #tpu.dot_dimension_numbers<[0], [0], [1], [1], [0, 1, 1, 1], [], []>} : vector<32x16xf32>, vector<32x16xf32>, vector<16x16xf32> -> vector<16x16xf32>
    %c0_8 = arith.constant 0 : index
    %c0_9 = arith.constant 0 : index
    %9 = vector.load %arg5[%c0_8, %c0_9] : memref<1x16xf32, #tpu.memory_space<vmem>>, vector<1x16xf32>
    %10 = vector.broadcast %9 : vector<1x16xf32> to vector<16x16xf32>
    %11 = arith.addf %8, %10 : vector<16x16xf32>
    %c0_10 = arith.constant 0 : index
    %c0_11 = arith.constant 0 : index
    %12 = vector.load %arg6[%c0_10, %c0_11] : memref<16x16xf32, #tpu.memory_space<vmem>>, vector<16x16xf32>
    tpu.vector_store %arg6[%c0_10, %c0_11], %11 {strides = array<i32>} : memref<16x16xf32, #tpu.memory_space<vmem>>, vector<16x16xf32>,
    return
  }
  func.func @transform_0(%arg0: i32) -> (i32, i32) {
    %c0_i32 = arith.constant 0 : i32
    %c0_i32_0 = arith.constant 0 : i32
    return %arg0, %c0_i32 : i32, i32
  }
  func.func @transform_1(%arg0: i32) -> (i32, i32) {
    %c0_i32 = arith.constant 0 : i32
    %c0_i32_0 = arith.constant 0 : i32
    %c0_i32_1 = arith.constant 0 : i32
    return %c0_i32, %c0_i32_0 : i32, i32
  }
  func.func @transform_2(%arg0: i32) -> (i32, i32) {
    %c0_i32 = arith.constant 0 : i32
    %c0_i32_0 = arith.constant 0 : i32
    %c0_i32_1 = arith.constant 0 : i32
    return %c0_i32, %c0_i32_0 : i32, i32
  }
  func.func @transform_3(%arg0: i32) -> (i32, i32) {
    %c0_i32 = arith.constant 0 : i32
    %c0_i32_0 = arith.constant 0 : i32
    %c0_i32_1 = arith.constant 0 : i32
    return %c0_i32, %c0_i32_0 : i32, i32
  }
  func.func @transform_4(%arg0: i32) -> (i32, i32) {
    %c0_i32 = arith.constant 0 : i32
    %c0_i32_0 = arith.constant 0 : i32
    %c0_i32_1 = arith.constant 0 : i32
    return %c0_i32, %c0_i32_0 : i32, i32
  }
  func.func @transform_5(%arg0: i32) -> (i32, i32) {
    %c0_i32 = arith.constant 0 : i32
    %c0_i32_0 = arith.constant 0 : i32
    return %arg0, %c0_i32 : i32, i32
  }
}

</mosaic_0001>

<bundles_post_ra>
// kernel: tpu_custom_call.1
= control target key start
LH: loop header
LB: loop body
LE: loop exit
PB: predicated region body
PF: predicated region fallthrough
CT: control target
= control target key end

     0   :  { %vm51_vm0 = vcmask 130048   ;;  %v397_v4 = vmov 0   ;;  %s496_s0 = inlined_call_operand.vmem [shape: f32[16,16], index: 0, kind: input, shape index: {}]   ;;  %s497_s1 = inlined_call_operand.vmem [shape: f32[32,16], index: 1, kind: input, shape index: {}]   ;;  %s498_s2 = inlined_call_operand.vmem [shape: f32[32,1], index: 2, kind: input, shape index: {}]   ;;  %s499_s3 = inlined_call_operand.vmem [shape: f32[32,16], index: 3, kind: input, shape index: {}]   ;;  %s500_s4 = inlined_call_operand.vmem [shape: f32[1,16], index: 4, kind: input, shape index: {}]   ;;  %s501_s5 = inlined_call_operand.hbm [shape: f32[16,16], index: 5, kind: output, shape index: {}]  }
   0x1   :  { %v21_v0 = vld [vmem:[%s496_s0] sm:$0xff]  ;;  %v22_v1 = vld [vmem:[%s496_s0 + $0x8] sm:$0xff]  ;;  %vm345_vm1 = vmpackc.low %vm51_vm0, %vm51_vm0  ;;  %363 = vset.pattern.permute.xlu0 %v397_v4  ;;  %364 = vset.pattern.permute.xlu1 %v397_v4 }
   0x2   :  { %v23_v2 = vld [vmem:[%s497_s1] sm:$0xff]  ;;  %v344_v3 = vpack.c.bf16 %v22_v1, %v21_v0  ;;  %v29_v6 = vld [vmem:[%s498_s2 + $0x10] sm:$0xff] }
   0x3   :  { %327 = vmatprep.mubr.msk.f32.mxu0 %vm51_vm0, %v23_v2  ;;  %v27_v5 = vld [vmem:[%s498_s2] sm:$0xff] }
   0x4   :  { %346 = vmatprep.subr.msk.bf16.mxu0 %vm345_vm1, %v344_v3  ;;  %33 = vperm.xlu0 %363, %v27_v5  }
   0x5   :  { %10 = vsyncpa [#allocation3], 0  ;;  %349 = vmatpush3.bf16.xpose.msk.msra.mxu0 %vm345_vm1, %v344_v3  ;;  %v28_v7 = vld [vmem:[%s498_s2 + $0x8] sm:$0xff]  ;;  %43 = vperm.xlu1 %364, %v29_v6   ;;  %v30_v8 = vld [vmem:[%s498_s2 + $0x18] sm:$0xff]  ;;  %vm202_vm2 = vcmask 261120  }
   0x6   :  { %v24_v9 = vld [vmem:[%s497_s1 + $0x8] sm:$0xff]  ;;  %v25_v10 = vld [vmem:[%s497_s1 + $0x10] sm:$0xff]  ;;  %v26_v11 = vld [vmem:[%s497_s1 + $0x18] sm:$0xff] }
   0x7   :  { %v159_v12 = vld [vmem:[%s499_s3] sm:$0xff]  ;;  %v160_v13 = vld [vmem:[%s499_s3 + $0x8] sm:$0xff]  ;;  %v161_v27 = vld [vmem:[%s499_s3 + $0x10] sm:$0xff] }
   0x8   :  { %38 = vperm.xlu0 %363, %v28_v7   ;;  %v350_v14 = vpack.c.bf16 %v160_v13, %v159_v12  ;;  %v162_v28 = vld [vmem:[%s499_s3 + $0x18] sm:$0xff]  ;;  %v308_v36 = vld [vmem:[%s500_s4] ss:$0 sm:$0xff]  ;;  %s398_s3 = smov [#allocation2]  }
   0x9   :  { %48 = vperm.xlu1 %364, %v30_v8   ;;  %v354_v30 = vpack.c.bf16 %v162_v28, %v161_v27  ;;  %s291_s20 = sshll.u32 %s398_s3, 4  ;;  %s292_s20 = int_to_ptr.vmem [resolvable:$true] %s291_s20 }
   0xa   :  { %351 = vmatprep.subr.bf16.mxu1 %v350_v14  ;;  %s373_s21 = scalar_lea.vmem %s292_s20, 256  ;;  %p378_p1 = scmp.lt.s32.totalorder %s292_s20, %s292_s20 }
   0xb   :  { %353 = vmatpush3.bf16.msra.mxu1 %v350_v14  ;;  %p374_p0 = scmp.ne.s32.totalorder %s292_s20, %s373_s21  ;;  %p379_p2 = scmp.lt.s32.totalorder %s373_s21, %s373_s21 }
   0xc   :  { %328 = vmatmul.mubr.msk.f32.vlgmr.msra.gmra.mrb[0].mxu0 %vm51_vm0, %v24_v9  ;;  %355 = vmatprep.subr.bf16.mxu1 %v354_v30 }
   0xd   :  { %330 = vmatprep.mubr.msk.f32.mxu0 %vm51_vm0, %v25_v10  ;;  %p380_p3 = por %p379_p2, %p378_p1 }
   0xf   :  { %357 = vmatpush3.bf16.msra.mxu1 %v354_v30  ;;  %p381_p4 = pnand %p380_p3, %p374_p0 }
  0x10   :  { %331 = vmatmul.mubr.msk.f32.gmra.mrb[2].mxu0 %vm51_vm0, %v26_v11 }
  0x83   :  { %v34_v15 = vpop.permute.xlu0 %33 }
  0x84   :  { %v44_v20 = vpop.permute.xlu1 %43 }
  0x87   :  { %v39_v17 = vpop.permute.xlu0 %38 }
  0x88   :  { %v49_v25 = vpop.permute.xlu1 %48 }
  0xdf   :  { %v329_v16 = vpop.f32.mrb[0].mxu0 }
  0xe0   :  { %v136_v18 = vpop.f32.mrb[1].mxu0  ;;  %v142_v21 = vadd.f32 %v329_v16, %v39_v17 }
  0xe1   :  { %v137_v19 = vadd.f32 %v136_v18, %v34_v15 }
  0xe3   :  { %365 = vtanh.f32 %v137_v19  ;;  %v332_v22 = vpop.f32.mrb[2].mxu0 }
  0xe4   :  { %v146_v23 = vpop.f32.mrb[3].mxu0  ;;  %367 = vtanh.f32 %v142_v21  ;;  %v152_v26 = vadd.f32 %v332_v22, %v49_v25 }
  0xe5   :  { %v147_v24 = vadd.f32 %v146_v23, %v44_v20 }
  0xe7   :  { %369 = vtanh.f32 %v147_v24 }
  0xe8   :  { %371 = vtanh.f32 %v152_v26 }
  0xed   :  { %v366_v29 = vpop.eup %365 }
  0xee   :  { %170 = vxpose.xlu0.b32.start [1/4] (short) (narrow) %v366_v29, 16  ;;  %v368_v31 = vpop.eup %367 }
  0xf1   :  { %v370_v32 = vpop.eup %369 }
  0xf2   :  { %171 = vxpose.xlu0.b32.cont [2/4] (short) (narrow) %v368_v31, 16  ;;  %v372_v33 = vpop.eup %371 }
  0xf6   :  { %172 = vxpose.xlu0.b32.cont [3/4] (short) (narrow) %v370_v32, 16 }
  0xfa   :  { %173 = vxpose.xlu0.b32.end [4/4] (short) (narrow) %v372_v33, 16 }
 0x16e   :  { %v186_v34 = vpop.trf.xlu0 }
 0x16f   :  { %341 = vmatprep.mubr.msk.f32.mxu1 %vm202_vm2, %v186_v34 }
 0x172   :  { %v187_v35 = vpop.trf.xlu0 }
 0x173   :  { %342 = vmatmul.mubr.msk.f32.vlgmr.msra.gmra.mrb[0].mxu1 %vm202_vm2, %v187_v35 }
 0x246   :  { %v343_v37 = vpop.f32.mrb[0].mxu1 }
 0x247   :  { %v281_v38 = vadd.f32 %v343_v37, %v308_v36  ;;  %v275_v39 = vpop.f32.mrb[1].mxu1 }
 0x248   :  { %v276_v40 = vadd.f32 %v308_v36, %v275_v39 }
 0x249   :  { %285 = vst.msk [vmem:[#allocation2 + $0x8] sm:$0xff] %vm51_vm0, %v281_v38 }
 0x24a   :  { %284 = vst.msk [vmem:[#allocation2] sm:$0xff] %vm51_vm0, %v276_v40 }
 0x24b   :  { %384 = shalt.err (!%p381_p4)
}
 0x24c   :  { %s385_s23 = scalar_lea.hbm %s501_s5, 256 }
 0x24d   :  { %p386_p5 = scmp.ne.s32.totalorder %s501_s5, %s385_s23  ;;  %p389_p6 = scmp.lt.u32.totalorder %s385_s23, %s501_s5 }
 0x24f   :  { %p391_p7 = pnand %p389_p6, %p386_p5 }
 0x251   :  { %394 = shalt.err (!%p391_p7)
}
 0x252   :  { %s399_s27 = smov 128   ;;  %s400_s28 = smov 8  }
 0x253   :  { %297 = dma.vmem_to_hbm [thread:$0]  %s292_s20, 256, %s501_s5, [#allocation3], %s399_s27, %s399_s27, %s400_s28  }
 0x254   :  { %395 = dma.done.wait [#allocation3], 256  }
 0x255   :  { %396 = vsyncadd [#allocation3], 4294967040 }
 0x256   :  { %301 = vsyncpa [#allocation3], 1 }

</bundles_post_ra>
